<compile_context>
chip_gen: v5e
topology: v5e:2x2
jax: 0.10.0
libtpu: 0.0.40
codegen_flags: <defaults>
</compile_context>

<pallas_src>
import math

import jax
import jax.numpy as jnp
from jax import lax
from jax.experimental import pallas as pl
from jax.experimental.pallas import tpu as pltpu


# ---------------------------------------------------------------------------
# Helpers
# ---------------------------------------------------------------------------

def _pick_tile(n, candidates=(512, 256, 128, 64, 32, 16, 8)):
    """Largest candidate tile that evenly divides n; fall back to n (full dim)."""
    for c in candidates:
        if c <= n and n % c == 0:
            return c
    return n


def _vmem_limit_bytes():
    """~3/4 of physical VMEM (v5e/v6e: ~96 MiB, v7x: ~48 MiB); 64 MiB fallback."""
    try:
        return int(pltpu.get_tpu_info().vmem_capacity_bytes * 3 // 4)
    except Exception:
        return 64 * 1024 * 1024


# ---------------------------------------------------------------------------
# Pass 1 / Pass 3: row-tiled linear layer  y = x @ W + b
# ---------------------------------------------------------------------------

def _linear_kernel(x_ref, w_ref, b_ref, o_ref):
    # x_ref: (TR, Din) compute dtype; w_ref: (Din, Dout); b_ref: (1, Dout) f32.
    acc = jnp.dot(x_ref[...], w_ref[...], preferred_element_type=jnp.float32)
    o_ref[...] = (acc + b_ref[...]).astype(o_ref.dtype)


def _linear(x, w, b, out_dtype, *, vmem_limit, block_rows=None):
    n, d_in = x.shape
    d_out = w.shape[1]
    tr = block_rows or _pick_tile(n)

    # Constant-index weights/bias: single-buffered (double buffering buys nothing
    # and doubles their VMEM footprint).
    w_spec = pl.BlockSpec((d_in, d_out), lambda i: (0, 0),
                          pipeline_mode=pl.Buffered(1))
    b_spec = pl.BlockSpec((1, d_out), lambda i: (0, 0),
                          pipeline_mode=pl.Buffered(1))

    return pl.pallas_call(
        _linear_kernel,
        out_shape=jax.ShapeDtypeStruct((n, d_out), out_dtype),
        grid_spec=pltpu.PrefetchScalarGridSpec(
            num_scalar_prefetch=0,
            grid=(n // tr,),
            in_specs=[pl.BlockSpec((tr, d_in), lambda i: (i, 0)), w_spec, b_spec],
            out_specs=pl.BlockSpec((tr, d_out), lambda i: (i, 0)),
        ),
        compiler_params=pltpu.CompilerParams(
            dimension_semantics=("parallel",),
            vmem_limit_bytes=vmem_limit),
    )(x, w, b)


# ---------------------------------------------------------------------------
# Pass 2: flash-style attention over head-major (B, H, S, d_k) tensors
# ---------------------------------------------------------------------------

def _flash_kernel(q_ref, k_ref, v_ref, o_ref, m_sc, l_sc, acc_sc):
    # q_ref: (1,1,TQ,d_k)   k_ref/v_ref: (1,1,BK,d_k)   o_ref: (1,1,TQ,d_k)
    # Scratch (persists across the kv axis): m_sc/l_sc (TQ,1) f32, acc_sc (TQ,d_k) f32
    ki = pl.program_id(3)

    @pl.when(ki == 0)
    def _():
        m_sc[...] = jnp.full(m_sc.shape, -jnp.inf, dtype=m_sc.dtype)
        l_sc[...] = jnp.zeros(l_sc.shape, dtype=l_sc.dtype)
        acc_sc[...] = jnp.zeros(acc_sc.shape, dtype=acc_sc.dtype)

    q = q_ref[0, 0]          # (TQ, d_k), already carries the 1/sqrt(d_k) scale
    k = k_ref[0, 0]          # (BK, d_k)
    v = v_ref[0, 0]          # (BK, d_k)

    # scores (TQ, BK): contract the last dims directly (no explicit transpose).
    s = lax.dot_general(q, k, (((1,), (1,)), ((), ())),
                        preferred_element_type=jnp.float32)
    # TODO(synk): a masked path (mask is None in this forward) would add the
    # large-negative mask to `s` here, before the running max / exp.

    m_prev = m_sc[...]
    m_new = jnp.maximum(m_prev, jnp.max(s, axis=-1, keepdims=True))
    alpha = jnp.exp(m_prev - m_new)
    p = jnp.exp(s - m_new)
    l_sc[...] = alpha * l_sc[...] + jnp.sum(p, axis=-1, keepdims=True)
    acc_sc[...] = alpha * acc_sc[...] + jnp.dot(
        p.astype(v.dtype), v, preferred_element_type=jnp.float32)
    m_sc[...] = m_new

    @pl.when(ki == pl.num_programs(3) - 1)
    def _():
        # TODO(synk): dropout(p=0.1) on the attention weights is identity in eval mode.
        o_ref[0, 0] = (acc_sc[...] *
                       pl.reciprocal(l_sc[...], approx=True)).astype(o_ref.dtype)


def _flash_attention(q, k, v, *, vmem_limit, block_q=None, block_k=None):
    """q/k/v: (B, H, S, d_k); q is pre-scaled by 1/sqrt(d_k)."""
    B, H, S, d_k = q.shape
    tq = block_q or _pick_tile(S)
    bk = block_k or _pick_tile(S)

    q_spec = pl.BlockSpec((1, 1, tq, d_k), lambda b, h, qi, ki: (b, h, qi, 0))
    kv_spec = pl.BlockSpec((1, 1, bk, d_k), lambda b, h, qi, ki: (b, h, ki, 0))

    return pl.pallas_call(
        _flash_kernel,
        out_shape=jax.ShapeDtypeStruct((B, H, S, d_k), q.dtype),
        grid_spec=pltpu.PrefetchScalarGridSpec(
            num_scalar_prefetch=0,
            grid=(B, H, S // tq, S // bk),
            in_specs=[q_spec, kv_spec, kv_spec],
            out_specs=q_spec,
            scratch_shapes=[pltpu.VMEM((tq, 1), jnp.float32),
                            pltpu.VMEM((tq, 1), jnp.float32),
                            pltpu.VMEM((tq, d_k), jnp.float32)],
        ),
        compiler_params=pltpu.CompilerParams(
            dimension_semantics=("parallel", "parallel", "parallel", "arbitrary"),
            vmem_limit_bytes=vmem_limit),
    )(q, k, v)


# ---------------------------------------------------------------------------
# Full module forward
# ---------------------------------------------------------------------------

def multi_headed_attention(q, k, v, params, num_heads,
                           compute_dtype=jnp.bfloat16,
                           block_q=None, block_k=None):
    """q, k, v: (B, S, D); params: dict of weights/biases (see init_params)."""
    B, S, D = q.shape
    assert D % num_heads == 0, "d_model must be divisible by the number of heads"
    d_k = D // num_heads
    out_dtype = q.dtype
    cdt = compute_dtype
    f32 = jnp.float32
    vmem_limit = _vmem_limit_bytes()

    # Fold the 1/sqrt(d_k) score scale into the Q projection (done once, on the
    # weights — removes the per-step scaling of the (TQ, BK) scores tensor).
    scale = 1.0 / math.sqrt(d_k)
    wq = (params["wq"].astype(f32) * scale).astype(cdt)
    bq = params["bq"].astype(f32) * scale
    wk = params["wk"].astype(cdt)
    bk_ = params["bk"].astype(f32)
    wv = params["wv"].astype(cdt)
    bv = params["bv"].astype(f32)
    wo = params["wo"].astype(cdt)
    bo = params["bo"].astype(f32)

    def split_heads(x2d):  # (B*S, D) -> (B, H, S, d_k): one-shot XLA relayout
        return x2d.reshape(B, S, num_heads, d_k).transpose(0, 2, 1, 3)

    # Pass 1: projections, each computed exactly once (no per-q-tile recompute).
    q2d = q.reshape(B * S, D).astype(cdt)
    k2d = k.reshape(B * S, D).astype(cdt)
    v2d = v.reshape(B * S, D).astype(cdt)
    Qh = split_heads(_linear(q2d, wq, bq, cdt, vmem_limit=vmem_limit))
    Kh = split_heads(_linear(k2d, wk, bk_, cdt, vmem_limit=vmem_limit))
    Vh = split_heads(_linear(v2d, wv, bv, cdt, vmem_limit=vmem_limit))

    # Pass 2: flash attention with KV blocking + online softmax.
    ctx = _flash_attention(Qh, Kh, Vh, vmem_limit=vmem_limit,
                           block_q=block_q, block_k=block_k)

    # Merge heads (one-shot relayout), then Pass 3: single full-D output GEMM.
    ctx2d = ctx.transpose(0, 2, 1, 3).reshape(B * S, D)
    out2d = _linear(ctx2d, wo, bo, out_dtype, vmem_limit=vmem_limit)
    return out2d.reshape(B, S, D)


# ---------------------------------------------------------------------------
# Reference + demo
# ---------------------------------------------------------------------------

def _reference(q, k, v, params, num_heads):
    """Pure-JAX reference mirroring the PyTorch forward (eval mode, mask=None)."""
    B, S, D = q.shape
    d_k = D // num_heads

    def lin(x, w, b):
        return x @ w + b

    def split(x):  # (B,S,D) -> (B,H,S,d_k)
        return x.reshape(B, S, num_heads, d_k).transpose(0, 2, 1, 3)

    Q = split(lin(q, params["wq"], params["bq"]))
    K = split(lin(k, params["wk"], params["bk"]))
    V = split(lin(v, params["wv"], params["bv"]))
    scores = jnp.einsum("bhqd,bhkd->bhqk", Q, K) / math.sqrt(d_k)
    p = jax.nn.softmax(scores, axis=-1)
    ctx = jnp.einsum("bhqk,bhkd->bhqd", p, V)
    ctx = ctx.transpose(0, 2, 1, 3).reshape(B, S, D)
    return lin(ctx, params["wo"], params["bo"])


def init_params(key, d_model):
    """Deterministic parameter init (4 linears of d_model -> d_model)."""
    names = ["q", "k", "v", "o"]
    keys = jax.random.split(key, 2 * len(names))
    params = {}
    bound = 1.0 / math.sqrt(d_model)
    for i, n in enumerate(names):
        params[f"w{n}"] = jax.random.uniform(
            keys[2 * i], (d_model, d_model), jnp.float32, -bound, bound)
        params[f"b{n}"] = jax.random.uniform(
            keys[2 * i + 1], (1, d_model), jnp.float32, -bound, bound)
    return params


if __name__ == "__main__":
    B, S, D, H = 2, 8, 32, 4   # batch, seq, d_model, heads  (d_k = 8)

    root = jax.random.PRNGKey(0)
    kq, kk, kv, kp = jax.random.split(root, 4)
    q = jax.random.normal(kq, (B, S, D), jnp.float32)
    k = jax.random.normal(kk, (B, S, D), jnp.float32)
    v = jax.random.normal(kv, (B, S, D), jnp.float32)
    params = init_params(kp, D)

    ref = _reference(q, k, v, params, H)

    # f32-operand path: validates the kernel math tightly (approx reciprocal in
    # the softmax denominator is the only approximation).
    out_f32 = jax.block_until_ready(
        multi_headed_attention(q, k, v, params, H, compute_dtype=jnp.float32))
    assert out_f32.shape == (B, S, D)
    assert jnp.allclose(out_f32, ref, atol=5e-3, rtol=5e-3), "f32 path mismatch"

    # Default bf16-MXU-operand path (f32 accumulation / softmax): looser tol.
    out_bf16 = jax.block_until_ready(multi_headed_attention(q, k, v, params, H))
    assert out_bf16.shape == (B, S, D)
    assert jnp.allclose(out_bf16, ref, atol=5e-2, rtol=5e-2), "bf16 path mismatch"

    print("KERNEL_OK")
</pallas_src>

<mosaic_0001>
module attributes {stable_mosaic.version = 11 : i64} {
  func.func @_linear_kernel(%arg0: i32, %arg1: memref<16x32xf32, #tpu.memory_space<vmem>>, %arg2: memref<32x32xf32, #tpu.memory_space<vmem>>, %arg3: memref<1x32xf32, #tpu.memory_space<vmem>>, %arg4: memref<16x32xf32, #tpu.memory_space<vmem>>) attributes {dimension_semantics = [#tpu.dimension_semantics<parallel>], iteration_bounds = array<i64: 1>, scalar_prefetch = 0 : i64, scratch_operands = 0 : i64, tpu.core_type = #tpu.core_type<tc>, window_params = [{transform_indices = @transform_0, window_bounds = array<i64: 16, 32>}, {pipeline_mode = #tpu.pipeline_mode<synchronous>, transform_indices = @transform_1, window_bounds = array<i64: 32, 32>}, {pipeline_mode = #tpu.pipeline_mode<synchronous>, transform_indices = @transform_2, window_bounds = array<i64: 1, 32>}, {transform_indices = @transform_3, window_bounds = array<i64: 16, 32>}]} {
    %c0 = arith.constant 0 : index
    %c0_0 = arith.constant 0 : index
    %0 = vector.load %arg1[%c0, %c0_0] : memref<16x32xf32, #tpu.memory_space<vmem>>, vector<16x32xf32>
    %c0_1 = arith.constant 0 : index
    %c0_2 = arith.constant 0 : index
    %1 = vector.load %arg2[%c0_1, %c0_2] : memref<32x32xf32, #tpu.memory_space<vmem>>, vector<32x32xf32>
    %cst = arith.constant dense<0.000000e+00> : vector<16x32xf32>
    %2 = tpu.matmul %0, %1, %cst {dimension_numbers = #tpu.dot_dimension_numbers<[1], [0], [0], [1], [0, 0, 1, 1], [], []>} : vector<16x32xf32>, vector<32x32xf32>, vector<16x32xf32> -> vector<16x32xf32>
    %c0_3 = arith.constant 0 : index
    %c0_4 = arith.constant 0 : index
    %3 = vector.load %arg3[%c0_3, %c0_4] : memref<1x32xf32, #tpu.memory_space<vmem>>, vector<1x32xf32>
    %4 = vector.broadcast %3 : vector<1x32xf32> to vector<16x32xf32>
    %5 = arith.addf %2, %4 : vector<16x32xf32>
    %c0_5 = arith.constant 0 : index
    %c0_6 = arith.constant 0 : index
    %6 = vector.load %arg4[%c0_5, %c0_6] : memref<16x32xf32, #tpu.memory_space<vmem>>, vector<16x32xf32>
    tpu.vector_store %arg4[%c0_5, %c0_6], %5 {strides = array<i32>} : memref<16x32xf32, #tpu.memory_space<vmem>>, vector<16x32xf32>,
    return
  }
  func.func @transform_0(%arg0: i32) -> (i32, i32) {
    %c0_i32 = arith.constant 0 : i32
    %c0_i32_0 = arith.constant 0 : i32
    return %arg0, %c0_i32 : i32, i32
  }
  func.func @transform_1(%arg0: i32) -> (i32, i32) {
    %c0_i32 = arith.constant 0 : i32
    %c0_i32_0 = arith.constant 0 : i32
    %c0_i32_1 = arith.constant 0 : i32
    return %c0_i32, %c0_i32_0 : i32, i32
  }
  func.func @transform_2(%arg0: i32) -> (i32, i32) {
    %c0_i32 = arith.constant 0 : i32
    %c0_i32_0 = arith.constant 0 : i32
    %c0_i32_1 = arith.constant 0 : i32
    return %c0_i32, %c0_i32_0 : i32, i32
  }
  func.func @transform_3(%arg0: i32) -> (i32, i32) {
    %c0_i32 = arith.constant 0 : i32
    %c0_i32_0 = arith.constant 0 : i32
    return %arg0, %c0_i32 : i32, i32
  }
}

</mosaic_0001>

<bundles_post_ra>
// kernel: tpu_custom_call.1
= control target key start
LH: loop header
LB: loop body
LE: loop exit
PB: predicated region body
PF: predicated region fallthrough
CT: control target
= control target key end

     0   :  { %8 = vsyncpa [#allocation3], 0  ;;  %s249_s0 = inlined_call_operand.hbm [shape: f32[16,32], index: 0, kind: input, shape index: {}]   ;;  %s250_s1 = inlined_call_operand.hbm [shape: f32[32,32], index: 1, kind: input, shape index: {}]   ;;  %s251_s2 = inlined_call_operand.vmem [shape: f32[1,32], index: 2, kind: input, shape index: {}]   ;;  %s252_s3 = inlined_call_operand.hbm [shape: f32[16,32], index: 3, kind: output, shape index: {}]  }
   0x1   :  { %9 = vsyncpa [#allocation6], 0 }
   0x2   :  { %10 = vsyncpa [#allocation4], 0  ;;  %s15_s14 = sshll.u32 %s249_s0, 4  ;;  %s199_s15 = smov [#allocation2]   ;;  %s16_s14 = int_to_ptr.hbm [resolvable:$true] %s15_s14 }
   0x3   :  { %s17_s16 = sshll.u32 %s199_s15, 4  ;;  %s28_s19 = sshll.u32 %s250_s1, 4  ;;  %s18_s16 = int_to_ptr.vmem [resolvable:$true] %s17_s16  ;;  %s29_s19 = int_to_ptr.hbm [resolvable:$true] %s28_s19 }
   0x4   :  { %s200_s20 = smov 128   ;;  %s201_s21 = smov 8  }
   0x5   :  { %23 = dma.hbm_to_vmem [thread:$0]  %s16_s14, 256, %s18_s16, [#allocation3], %s200_s20, %s200_s20, %s201_s21  }
   0x6   :  { %s202_s22 = smov [#allocation5]  }
   0x7   :  { %s30_s23 = sshll.u32 %s202_s22, 4  ;;  %s31_s23 = int_to_ptr.vmem [resolvable:$true] %s30_s23 }
   0x8   :  { %36 = dma.hbm_to_vmem [thread:$0]  %s29_s19, 512, %s31_s23, [#allocation6], %s200_s20, %s200_s20, %s201_s21  }
   0x9   :  { %193 = dma.done.wait [#allocation3], 256  }
   0xa   :  { %194 = vsyncadd [#allocation3], 4294967040 }
   0xb   :  { %195 = dma.done.wait [#allocation6], 512  }
   0xc   :  { %196 = vsyncadd [#allocation6], 4294966784  ;;  %v52_v0 = vld [vmem:[#allocation5 + $0x18] sm:$0xff]  ;;  %v51_v1 = vld [vmem:[#allocation5 + $0x10] sm:$0xff]  ;;  %vm57_vm0 = vcmask 261120   ;;  %s203_s24 = smov [#allocation7]  }
   0xd   :  { %76 = vmatpush.msra.mxu0 %v52_v0  ;;  %111 = vmatpush.msra.mxu1 %v52_v0  ;;  %v50_v2 = vld [vmem:[#allocation5 + $0x8] sm:$0xff]  ;;  %v49_v3 = vld [vmem:[#allocation5] sm:$0xff]  ;;  %v47_v4 = vld [vmem:[#allocation2] sm:$0xff]  ;;  %s93_s25 = sshll.u32 %s203_s24, 4  ;;  %s95_s28 = sshll.u32 %s252_s3, 4  ;;  %s94_s25 = int_to_ptr.vmem [resolvable:$true] %s93_s25  ;;  %s96_s28 = int_to_ptr.hbm [resolvable:$true] %s95_s28 }
   0xe   :  { %v48_v5 = vld [vmem:[#allocation2 + $0x8] sm:$0xff]  ;;  %v120_v6 = vld [vmem:[%s251_s2] ss:$0 sm:$0xff] }
   0xf   :  { %77 = vmatpush.msra.mxu0 %v51_v1  ;;  %112 = vmatpush.msra.mxu1 %v51_v1 }
  0x11   :  { %78 = vmatpush.msra.mxu0 %v50_v2  ;;  %113 = vmatpush.msra.mxu1 %v50_v2 }
  0x13   :  { %79 = vmatpush.msra.mxu0 %v49_v3  ;;  %114 = vmatpush.msra.mxu1 %v49_v3 }
  0x14   :  { %109 = vmatmul.msk.f32.vlgmr.msra.gmra.mxu0 %vm57_vm0, %v47_v4  ;;  %110 = vmatmul.msk.f32.vlgmr.msra.gmra.mxu1 %vm57_vm0, %v48_v5 }
  0x91   :  { %v81_v7 = vpop.f32.mrf.mxu0  ;;  %v84_v8 = vpop.f32.mrf.mxu1 }
  0x92   :  { %v82_v9 = vadd.f32 %v120_v6, %v81_v7  ;;  %v85_v10 = vadd.f32 %v120_v6, %v84_v8 }
  0x94   :  { %87 = vst.msk [vmem:[#allocation7] sm:$0xff] %vm57_vm0, %v82_v9 }
  0x95   :  { %88 = vst.msk [vmem:[#allocation7 + $0x8] sm:$0xff] %vm57_vm0, %v85_v10 }
  0x96   :  { %101 = dma.vmem_to_hbm [thread:$0]  %s94_s25, 256, %s96_s28, [#allocation4], %s200_s20, %s200_s20, %s201_s21  }
  0x97   :  { %197 = dma.done.wait [#allocation4], 256  }
  0x98   :  { %198 = vsyncadd [#allocation4], 4294967040 }
  0x99   :  { %106 = vsyncpa [#allocation3], 1 }
  0x9a   :  { %107 = vsyncpa [#allocation6], 1 }
  0x9b   :  { %108 = vsyncpa [#allocation4], 1 }

</bundles_post_ra>
